<compile_context>
chip_gen: v7x
topology: tpu7x:2x2x1
jax: 0.10.0
libtpu: 0.0.40
codegen_flags: <defaults>
</compile_context>

<pallas_src>
import functools

import jax
import jax.numpy as jnp
from jax.experimental import pallas as pl
from jax.experimental.pallas import tpu as pltpu

IGNORE_INDEX = -100
_NEG_INF = float("-inf")


def _ce_kernel(logits_ref, targets_ref, nll_ref, m_ref, s_ref, t_ref, *,
               n_total, c_total, ignore_index):
    """One (row-block, class-chunk) step of masked per-row cross entropy.

    Scratch (per row block, carried across the class-chunk axis):
      m_ref (TN,1) native : running row max
      s_ref (TN,1) f32    : running sum(exp(x - m))
      t_ref (TN,1) f32    : target logit (unshifted)
    """
    i = pl.program_id(0)            # row-block index ("parallel")
    j = pl.program_id(1)            # class-chunk index ("arbitrary" reduction)
    nj = pl.num_programs(1)

    chunk = logits_ref[...]         # (TN, TC) native dtype (do not pre-cast)
    tgt = targets_ref[...]          # (TN, 1) int32
    tn, tc = chunk.shape

    @pl.when(j == 0)
    def _init():
        m_ref[...] = jnp.full(m_ref.shape, _NEG_INF, m_ref.dtype)
        s_ref[...] = jnp.zeros(s_ref.shape, s_ref.dtype)
        t_ref[...] = jnp.zeros(t_ref.shape, t_ref.dtype)

    col = jax.lax.broadcasted_iota(jnp.int32, (tn, tc), 1)

    # Mask the padded tail of the last class chunk.  Compiled in only when the
    # chunking is ragged (C % TC != 0); padded columns -> -inf so they drop
    # out of both the max and the exp-sum.
    if c_total % tc != 0:
        chunk_m = jnp.where(col < (c_total - j * tc), chunk, _NEG_INF)
    else:
        chunk_m = chunk

    # Online logsumexp update.  Max / subtract stay in the input dtype
    # (packed bf16 vregs on v6e/v7x); exp and accumulation in f32.
    m_prev = m_ref[...]
    m_new = jnp.maximum(m_prev, jnp.max(chunk_m, axis=-1, keepdims=True))
    m_ref[...] = m_new
    sum_exp = jnp.sum(jnp.exp((chunk_m - m_new).astype(jnp.float32)),
                      axis=-1, keepdims=True)
    alpha = jnp.exp(m_prev.astype(jnp.float32) - m_new.astype(jnp.float32))
    s_ref[...] = alpha * s_ref[...] + sum_exp

    # Target-logit gather from the *unshifted* chunk in the native dtype.
    # Exactly one (or zero) nonzero per row -> casting after the reduce is
    # exact, and the select path does not depend on the max reduce.
    onehot = col == (tgt - j * tc)
    t_ref[...] += jnp.sum(jnp.where(onehot, chunk, jnp.zeros_like(chunk)),
                          axis=-1, keepdims=True).astype(jnp.float32)

    @pl.when(j == nj - 1)
    def _finalize():
        row_ids = jax.lax.broadcasted_iota(jnp.int32, (tn, 1), 0) + i * tn
        valid = (row_ids < n_total) & (tgt != ignore_index)      # (TN,1) bool
        lse = jnp.log(s_ref[...]) + m_ref[...].astype(jnp.float32)
        # loss_row = logsumexp(x) - x[target]; 0 for ignored / padded rows.
        nll_ref[...] = jnp.where(valid, lse - t_ref[...], 0.0)


def _pick_blocks(n, c, itemsize, *, max_chunk_cols=2048,
                 budget_bytes=20 * 1024 * 1024, max_rows=2048):
    """Choose (block_rows, chunk_cols).

    The budget counts the double-buffered input chunk PLUS ~4 block-sized f32
    live temporaries (shifted/exp, iota, compare, select), so the real VMEM
    footprint stays inside v7x's 64 MiB physical / v5e's 16 MiB default-scoped
    VMEM while keeping multi-MiB of logits per grid step for HBM-roofline
    amortization on v6e/v5e.
    """
    tc = c if c <= max_chunk_cols else max_chunk_cols  # max_chunk_cols % 128 == 0
    per_row_bytes = tc * (2 * itemsize + 4 * 4)
    rows = max(8, budget_bytes // per_row_bytes)
    rows = min((int(rows) // 8) * 8, max_rows)
    if rows >= n:
        return n, tc
    return rows, tc


def cross_entropy_loss(logits, targets, *, ignore_index=IGNORE_INDEX,
                       block_rows=None, chunk_cols=None):
    """Mean cross entropy over non-ignored samples (nn.CrossEntropyLoss defaults).

    logits: (N, C) or (N, C, d1, ...) float array (keep bf16 narrow in HBM —
            do NOT pre-cast; bf16 carries ~1e-3 relative error like PyTorch).
    targets: (N,) or (N, d1, ...) integer class indices.
    """
    if logits.ndim > 2:
        # PyTorch k-d case: (N, C, d1, ...) + (N, d1, ...) -> (M, C) / (M,)
        c = logits.shape[1]
        perm = (0,) + tuple(range(2, logits.ndim)) + (1,)
        logits = jnp.transpose(logits, perm).reshape(-1, c)
        targets = targets.reshape(-1)

    n, c = logits.shape
    targets2d = targets.reshape(n, 1).astype(jnp.int32)

    itemsize = jnp.dtype(logits.dtype).itemsize
    auto_rows, auto_cols = _pick_blocks(n, c, itemsize)
    tn = block_rows if block_rows is not None else auto_rows
    tc = chunk_cols if chunk_cols is not None else auto_cols
    nb = pl.cdiv(n, tn)
    nc = pl.cdiv(c, tc)

    # Explicit VMEM cap: double-buffered input chunks + ~5 f32 block temps
    # + margin (don't rely on the default scoped limit).
    est = 2 * tn * tc * itemsize + 5 * tn * tc * 4 + (4 << 20)
    vmem_limit = int(min(64 << 20, max(est, 32 << 20)))

    kernel = functools.partial(
        _ce_kernel, n_total=n, c_total=c, ignore_index=ignore_index)

    nll = pl.pallas_call(
        kernel,
        grid=(nb, nc),
        in_specs=[
            pl.BlockSpec((tn, tc), lambda i, j: (i, j)),   # logits chunk
            pl.BlockSpec((tn, 1), lambda i, j: (i, 0)),    # targets (const over j)
        ],
        out_specs=pl.BlockSpec((tn, 1), lambda i, j: (i, 0)),  # per-row NLL
        out_shape=jax.ShapeDtypeStruct((n, 1), jnp.float32),
        scratch_shapes=[
            pltpu.VMEM((tn, 1), logits.dtype),   # running max
            pltpu.VMEM((tn, 1), jnp.float32),    # running exp-sum
            pltpu.VMEM((tn, 1), jnp.float32),    # target logit
        ],
        compiler_params=pltpu.CompilerParams(
            dimension_semantics=("parallel", "arbitrary"),
            vmem_limit_bytes=vmem_limit),
    )(logits, targets2d)

    valid = targets2d[:, 0] != ignore_index
    total = jnp.sum(nll)                         # ignored rows contribute 0
    count = jnp.sum(valid.astype(jnp.float32))   # exact up to 2**24 rows
    # Matches PyTorch 'mean' semantics: all targets ignored -> 0/0 = NaN.
    return total / count


def _ref_ce(logits, targets, ignore_index=IGNORE_INDEX):
    """Plain-JAX reference of nn.CrossEntropyLoss with default args."""
    logp = jax.nn.log_softmax(logits.astype(jnp.float32), axis=-1)
    valid = targets != ignore_index
    safe_t = jnp.where(valid, targets, 0)
    nll = -jnp.take_along_axis(logp, safe_t[:, None], axis=-1)[:, 0]
    return jnp.sum(jnp.where(valid, nll, 0.0)) / jnp.sum(valid)


if __name__ == "__main__":
    key = jax.random.PRNGKey(0)
    k1, k2, k3, k4 = jax.random.split(key, 4)

    # Case 1: multiple row blocks, a partial last row block, ignore_index row,
    # single class chunk (C == chunk).
    N, C = 20, 32
    logits = jax.random.normal(k1, (N, C), dtype=jnp.float32)
    targets = jax.random.randint(k2, (N,), 0, C, dtype=jnp.int32)
    targets = targets.at[3].set(IGNORE_INDEX)
    out = jax.block_until_ready(cross_entropy_loss(logits, targets, block_rows=8))
    ref = _ref_ce(logits, targets)
    assert jnp.allclose(out, ref, atol=1e-5, rtol=1e-5), (out, ref)

    # Case 2: exercises the class-chunked path (2-D grid, online logsumexp)
    # with a ragged last chunk (160 % 128 != 0) and chunk-fused target gather.
    N2, C2 = 24, 160
    logits2 = jax.random.normal(k3, (N2, C2), dtype=jnp.float32)
    targets2 = jax.random.randint(k4, (N2,), 0, C2, dtype=jnp.int32)
    out2 = jax.block_until_ready(
        cross_entropy_loss(logits2, targets2, block_rows=8, chunk_cols=128))
    ref2 = _ref_ce(logits2, targets2)
    assert jnp.allclose(out2, ref2, atol=1e-5, rtol=1e-5), (out2, ref2)

    print("KERNEL_OK")
</pallas_src>

<mosaic_0001>
module attributes {stable_mosaic.version = 11 : i64} {
  func.func @_ce_kernel(%arg0: i32, %arg1: i32, %arg2: memref<8x32xf32, #tpu.memory_space<vmem>>, %arg3: memref<8x1xi32, #tpu.memory_space<vmem>>, %arg4: memref<8x1xf32, #tpu.memory_space<vmem>>, %arg5: memref<8x1xf32, #tpu.memory_space<vmem>>, %arg6: memref<8x1xf32, #tpu.memory_space<vmem>>, %arg7: memref<8x1xf32, #tpu.memory_space<vmem>>) attributes {dimension_semantics = [#tpu.dimension_semantics<parallel>, #tpu.dimension_semantics<arbitrary>], iteration_bounds = array<i64: 3, 1>, scalar_prefetch = 0 : i64, scratch_operands = 3 : i64, tpu.core_type = #tpu.core_type<tc>, window_params = [{transform_indices = @transform_0, window_bounds = array<i64: 8, 32>}, {transform_indices = @transform_1, window_bounds = array<i64: 8, 1>}, {transform_indices = @transform_2, window_bounds = array<i64: 8, 1>}]} {
    %c0 = arith.constant 0 : index
    %c0_0 = arith.constant 0 : index
    %0 = vector.load %arg2[%c0, %c0_0] : memref<8x32xf32, #tpu.memory_space<vmem>>, vector<8x32xf32>
    %c0_1 = arith.constant 0 : index
    %c0_2 = arith.constant 0 : index
    %1 = vector.load %arg3[%c0_1, %c0_2] : memref<8x1xi32, #tpu.memory_space<vmem>>, vector<8x1xi32>
    %c0_i32 = arith.constant 0 : i32
    %2 = arith.cmpi eq, %arg1, %c0_i32 : i32
    %3 = arith.extui %2 : i1 to i32
    %c0_i32_3 = arith.constant 0 : i32
    %4 = arith.cmpi ne, %3, %c0_i32_3 : i32
    scf.if %4 {
      %cst_21 = arith.constant 0xFF800000 : f32
      %37 = vector.broadcast %cst_21 : f32 to vector<8x1xf32>
      %c0_22 = arith.constant 0 : index
      %c0_23 = arith.constant 0 : index
      %38 = vector.load %arg5[%c0_22, %c0_23] : memref<8x1xf32, #tpu.memory_space<vmem>>, vector<8x1xf32>
      tpu.vector_store %arg5[%c0_22, %c0_23], %37 {strides = array<i32>} : memref<8x1xf32, #tpu.memory_space<vmem>>, vector<8x1xf32>,
      %cst_24 = arith.constant 0.000000e+00 : f32
      %39 = vector.broadcast %cst_24 : f32 to vector<8x1xf32>
      %c0_25 = arith.constant 0 : index
      %c0_26 = arith.constant 0 : index
      %40 = vector.load %arg6[%c0_25, %c0_26] : memref<8x1xf32, #tpu.memory_space<vmem>>, vector<8x1xf32>
      tpu.vector_store %arg6[%c0_25, %c0_26], %39 {strides = array<i32>} : memref<8x1xf32, #tpu.memory_space<vmem>>, vector<8x1xf32>,
      %cst_27 = arith.constant 0.000000e+00 : f32
      %41 = vector.broadcast %cst_27 : f32 to vector<8x1xf32>
      %c0_28 = arith.constant 0 : index
      %c0_29 = arith.constant 0 : index
      %42 = vector.load %arg7[%c0_28, %c0_29] : memref<8x1xf32, #tpu.memory_space<vmem>>, vector<8x1xf32>
      tpu.vector_store %arg7[%c0_28, %c0_29], %41 {strides = array<i32>} : memref<8x1xf32, #tpu.memory_space<vmem>>, vector<8x1xf32>,
    } else {
    }
    %5 = tpu.iota {dimensions = array<i32: 1>} : vector<8x32xi32>
    %c0_4 = arith.constant 0 : index
    %c0_5 = arith.constant 0 : index
    %6 = vector.load %arg5[%c0_4, %c0_5] : memref<8x1xf32, #tpu.memory_space<vmem>>, vector<8x1xf32>
    %cst = arith.constant dense<0xFF800000> : vector<8xf32>
    %7 = vector.multi_reduction <maximumf>, %0, %cst [1] : vector<8x32xf32> to vector<8xf32>
    %8 = vector.shape_cast %7 : vector<8xf32> to vector<8x1xf32>
    %9 = arith.maximumf %6, %8 : vector<8x1xf32>
    %c0_6 = arith.constant 0 : index
    %c0_7 = arith.constant 0 : index
    %10 = vector.load %arg5[%c0_6, %c0_7] : memref<8x1xf32, #tpu.memory_space<vmem>>, vector<8x1xf32>
    tpu.vector_store %arg5[%c0_6, %c0_7], %9 {strides = array<i32>} : memref<8x1xf32, #tpu.memory_space<vmem>>, vector<8x1xf32>,
    %11 = vector.broadcast %9 : vector<8x1xf32> to vector<8x32xf32>
    %12 = arith.subf %0, %11 : vector<8x32xf32>
    %13 = math.exp %12 : vector<8x32xf32>
    %cst_8 = arith.constant dense<0.000000e+00> : vector<8xf32>
    %14 = vector.multi_reduction <add>, %13, %cst_8 [1] : vector<8x32xf32> to vector<8xf32>
    %15 = vector.shape_cast %14 : vector<8xf32> to vector<8x1xf32>
    %16 = arith.subf %6, %9 : vector<8x1xf32>
    %17 = math.exp %16 : vector<8x1xf32>
    %c0_9 = arith.constant 0 : index
    %c0_10 = arith.constant 0 : index
    %18 = vector.load %arg6[%c0_9, %c0_10] : memref<8x1xf32, #tpu.memory_space<vmem>>, vector<8x1xf32>
    %19 = arith.mulf %17, %18 : vector<8x1xf32>
    %20 = arith.addf %19, %15 : vector<8x1xf32>
    %c0_11 = arith.constant 0 : index
    %c0_12 = arith.constant 0 : index
    %21 = vector.load %arg6[%c0_11, %c0_12] : memref<8x1xf32, #tpu.memory_space<vmem>>, vector<8x1xf32>
    tpu.vector_store %arg6[%c0_11, %c0_12], %20 {strides = array<i32>} : memref<8x1xf32, #tpu.memory_space<vmem>>, vector<8x1xf32>,
    %c32_i32 = arith.constant 32 : i32
    %22 = arith.muli %arg1, %c32_i32 : i32
    %23 = vector.broadcast %22 : i32 to vector<8x1xi32>
    %24 = arith.subi %1, %23 : vector<8x1xi32>
    %25 = vector.broadcast %24 : vector<8x1xi32> to vector<8x32xi32>
    %26 = arith.cmpi eq, %5, %25 : vector<8x32xi32>
    %c0_13 = arith.constant 0 : index
    %c0_14 = arith.constant 0 : index
    %27 = vector.load %arg7[%c0_13, %c0_14] : memref<8x1xf32, #tpu.memory_space<vmem>>, vector<8x1xf32>
    %cst_15 = arith.constant 0.000000e+00 : f32
    %28 = vector.broadcast %cst_15 : f32 to vector<8x32xf32>
    %29 = arith.select %26, %0, %28 : vector<8x32xi1>, vector<8x32xf32>
    %cst_16 = arith.constant dense<0.000000e+00> : vector<8xf32>
    %30 = vector.multi_reduction <add>, %29, %cst_16 [1] : vector<8x32xf32> to vector<8xf32>
    %31 = vector.shape_cast %30 : vector<8xf32> to vector<8x1xf32>
    %32 = arith.addf %27, %31 : vector<8x1xf32>
    %c0_17 = arith.constant 0 : index
    %c0_18 = arith.constant 0 : index
    %33 = vector.load %arg7[%c0_17, %c0_18] : memref<8x1xf32, #tpu.memory_space<vmem>>, vector<8x1xf32>
    tpu.vector_store %arg7[%c0_17, %c0_18], %32 {strides = array<i32>} : memref<8x1xf32, #tpu.memory_space<vmem>>, vector<8x1xf32>,
    %c0_i32_19 = arith.constant 0 : i32
    %34 = arith.cmpi eq, %arg1, %c0_i32_19 : i32
    %35 = arith.extui %34 : i1 to i32
    %c0_i32_20 = arith.constant 0 : i32
    %36 = arith.cmpi ne, %35, %c0_i32_20 : i32
    scf.if %36 {
      %37 = tpu.iota {dimensions = array<i32: 0>} : vector<8x1xi32>
      %c8_i32 = arith.constant 8 : i32
      %38 = arith.muli %arg0, %c8_i32 : i32
      %39 = vector.broadcast %38 : i32 to vector<8x1xi32>
      %40 = arith.addi %37, %39 : vector<8x1xi32>
      %c20_i32 = arith.constant 20 : i32
      %41 = vector.broadcast %c20_i32 : i32 to vector<8x1xi32>
      %42 = arith.cmpi slt, %40, %41 : vector<8x1xi32>
      %c-100_i32 = arith.constant -100 : i32
      %43 = vector.broadcast %c-100_i32 : i32 to vector<8x1xi32>
      %44 = arith.cmpi ne, %1, %43 : vector<8x1xi32>
      %45 = arith.andi %42, %44 : vector<8x1xi1>
      %c0_21 = arith.constant 0 : index
      %c0_22 = arith.constant 0 : index
      %46 = vector.load %arg6[%c0_21, %c0_22] : memref<8x1xf32, #tpu.memory_space<vmem>>, vector<8x1xf32>
      %47 = math.log %46 : vector<8x1xf32>
      %c0_23 = arith.constant 0 : index
      %c0_24 = arith.constant 0 : index
      %48 = vector.load %arg5[%c0_23, %c0_24] : memref<8x1xf32, #tpu.memory_space<vmem>>, vector<8x1xf32>
      %49 = arith.addf %47, %48 : vector<8x1xf32>
      %c0_25 = arith.constant 0 : index
      %c0_26 = arith.constant 0 : index
      %50 = vector.load %arg7[%c0_25, %c0_26] : memref<8x1xf32, #tpu.memory_space<vmem>>, vector<8x1xf32>
      %51 = arith.subf %49, %50 : vector<8x1xf32>
      %cst_27 = arith.constant 0.000000e+00 : f32
      %52 = vector.broadcast %cst_27 : f32 to vector<8x1xf32>
      %53 = arith.select %45, %51, %52 : vector<8x1xi1>, vector<8x1xf32>
      %c0_28 = arith.constant 0 : index
      %c0_29 = arith.constant 0 : index
      %54 = vector.load %arg4[%c0_28, %c0_29] : memref<8x1xf32, #tpu.memory_space<vmem>>, vector<8x1xf32>
      tpu.vector_store %arg4[%c0_28, %c0_29], %53 {strides = array<i32>} : memref<8x1xf32, #tpu.memory_space<vmem>>, vector<8x1xf32>,
    } else {
    }
    return
  }
  func.func @transform_0(%arg0: i32, %arg1: i32) -> (i32, i32) {
    %c0_i32 = arith.constant 0 : i32
    return %arg0, %arg1 : i32, i32
  }
  func.func @transform_1(%arg0: i32, %arg1: i32) -> (i32, i32) {
    %c0_i32 = arith.constant 0 : i32
    %c0_i32_0 = arith.constant 0 : i32
    return %arg0, %c0_i32 : i32, i32
  }
  func.func @transform_2(%arg0: i32, %arg1: i32) -> (i32, i32) {
    %c0_i32 = arith.constant 0 : i32
    %c0_i32_0 = arith.constant 0 : i32
    return %arg0, %c0_i32 : i32, i32
  }
}

</mosaic_0001>

<bundles_post_ra>
// kernel: tpu_custom_call.1
= control target key start
LH: loop header
LB: loop body
LE: loop exit
PB: predicated region body
PF: predicated region fallthrough
CT: control target
= control target key end

     0   :  { %s415_s9 = smov 0   ;;  %s417_s10 = smov 0   ;;  %s471_s0 = inlined_call_operand.vmem [shape: f32[20,32], index: 0, kind: input, shape index: {}]   ;;  %s472_s1 = inlined_call_operand.vmem [shape: s32[20,1], index: 1, kind: input, shape index: {}]   ;;  %s473_s2 = inlined_call_operand.vmem [shape: f32[20,1], index: 2, kind: output, shape index: {}]  }
   0x1   :  { %s419_s11 = smov 0  }
   0x2 LB: > { %s24_s12 = sadd.s32 1, %s391_s10  ;;  %p331_p0 = scmp.ge.s32.totalorder %s395_s11, 1  ;;  %s395_s11 = sphi %s419_s11, %s12_s11   ;;  %s391_s10 = sphi %s417_s10, %s475_s10   ;;  %s387_s9 = sphi %s415_s9, %s474_s9  }
   0x3   : > { %p26_p1 = scmp.ge.s32.totalorder %s24_s12, 3  ;;  %p137_p2 = scmp.lt.s32.totalorder %s395_s11, 4 }
   0x5   : > { %s477_s12 = smov (%p26_p1, %s24_s12), 0  ;;  %p138_p3 = pnand %p331_p0, %p137_p2 }
   0x6   : > { %p164_p4 = scmp.lt.s32.totalorder (!%p138_p3), %s387_s9, 2  ;;  %vm185_vm0 = vcmask (!%p138_p3), 7168   ;;  %v397_v0 = vmov (!%p138_p3), -inf   ;;  %vm192_vm1 = vcmask (!%p138_p3), 261120   ;;  %v398_v3 = vmov (!%p138_p3), 0   ;;  %s335_s21 = sshll.u32 (!%p138_p3), %s387_s9, 3 }
   0x7   : > { %141 = sbr.rel (%p138_p3) target bundleno = 479 (0x1df), region = 28  ;;  %186 = vst.msk [vmem:[#allocation2] sm:$0xff] (!%p138_p3), %vm185_vm0, %v397_v0  ;;  %365 = vset.pattern.permute.xlu0 (!%p138_p3), %v398_v3  ;;  %366 = vset.pattern.permute.xlu1 (!%p138_p3), %v398_v3  ;;  %v399_v4 = vmov (!%p138_p3), 0.0   ;;  %v189_v13 = vlaneseq (!%p138_p3)  ;;  %v237_v31 = vstv (!%p138_p3), %s335_s21 }
   0x8   : > { %187 = vst.msk [vmem:[#allocation3] sm:$0xff] (!%p138_p3), %vm185_vm0, %v399_v4  ;;  %188 = vst.msk [vmem:[#allocation4] sm:$0xff] (!%p138_p3), %vm185_vm0, %v399_v4 }
   0x9   : > { %v190_v14 = vand.u32 (!%p138_p3), 127, %v189_v13  ;;  %v235_v30 = vshrl.u32 (!%p138_p3), %v189_v13, 7 }
   0xb   : > { %v238_v32 = vadd.s32 (!%p138_p3), %v237_v31, %v235_v30 }
   0xd   : > { %vm239_vm3 = vcmp.lt.s32.totalorder (!%p138_p3), %v238_v32, 20 }
   0xe   : > { %s165_s13 = scalar_select %p164_p4, %s387_s9, 2  ;;  %v191_v6 = vld [vmem:[#allocation2] sm:$0xff] }
   0xf   : > { %v213_v22 = vld [vmem:[#allocation3] sm:$0xff]  ;;  %v224_v26 = vld [vmem:[#allocation4] sm:$0xff] }
  0x10   : > { %s438_s14 = sshll.u32 %s165_s13, 3 }
  0x11   : > { %s170_s17 = scalar_lea.vmem %s471_s0, %s438_s14  ;;  %s174_s20 = scalar_lea.vmem %s472_s1, %s438_s14 }
  0x12   : > { %v179_v1 = vld [vmem:[%s170_s17] sm:$0xff]  ;;  %s178_s24 = scalar_lea.vmem %s473_s2, %s438_s14 }
  0x13   : > { %v193_v2 = vsel %vm192_vm1, %v179_v1, -inf  ;;  %v180_v5 = vld [vmem:[%s174_s20] sm:$0xff] }
  0x14   : > { %194 = vmax.xlane.f32.xlu0 %v193_v2  ;;  %221 = vperm.xlu1 %366, %v180_v5   ;;  %vm240_vm4 = vcmp.ne.s32.totalorder %v180_v5, 4294967196 }
  0x15   : > { %vm241_vm5 = vmand %vm239_vm3, %vm240_vm4 }
  0x93   : > { %v222_v15 = vpop.permute.xlu1 %221 }
  0x94   : > { %vm223_vm2 = vcmp.eq.s32.totalorder %v190_v14, %v222_v15 }
  0x95   : > { %v225_v17 = vsel %vm223_vm2, %v179_v1, 0.0 }
  0x96   : > { %v226_v19 = vsel %vm192_vm1, %v225_v17, 0.0 }
  0xa1   : > { %v195_v7 = vpop.xlane.xlu0 %194 }
  0xa2   : > { %v196_v8 = vmax.f32 %v191_v6, %v195_v7 }
  0xa4   : > { %198 = vst.msk [vmem:[#allocation2] sm:$0xff] %vm185_vm0, %v196_v8  ;;  %v210_v9 = vsub.f32 %v191_v6, %v196_v8  ;;  %201 = vperm.xlu0 %365, %v196_v8  }
  0xa6   : > { %v211_v20 = vmul.f32 1.442695, %v210_v9 }
  0xab   : > { %v245_v35 = vld [vmem:[#allocation2] sm:$0xff] }
 0x123   : > { %v202_v10 = vpop.permute.xlu0 %201 }
 0x124   : > { %v204_v11 = vsub.f32 %v179_v1, %v202_v10 }
 0x126   : > { %v205_v12 = vmul.f32 1.442695, %v204_v11 }
 0x128   : > { %367 = vpow2.f32 %v205_v12 }
 0x129   : > { %369 = vpow2.f32 %v211_v20 }
 0x132   : > { %v368_v16 = vpop.eup %367 }
 0x133   : > { %v207_v18 = vsel %vm192_vm1, %v368_v16, 0.0  ;;  %v370_v21 = vpop.eup %369 }
 0x134   : > { %208 = vadd.xlane.f32.xlu1 %v207_v18  ;;  %v214_v23 = vmul.f32 %v370_v21, %v213_v22 }
 0x138   : > { %227 = vadd.xlane.f32.xlu1 %v226_v19 }
 0x1c1   : > { %v209_v24 = vpop.xlane.xlu1 %208 }
 0x1c2   : > { %v215_v25 = vadd.f32 %v214_v23, %v209_v24 }
 0x1c4   : > { %216 = vst.msk [vmem:[#allocation3] sm:$0xff] %vm185_vm0, %v215_v25 }
 0x1c5   : > { %v228_v27 = vpop.xlane.xlu1 %227 }
 0x1c6   : > { %v229_v28 = vadd.f32 %v228_v27, %v224_v26 }
 0x1c8   : > { %230 = vst.msk [vmem:[#allocation4] sm:$0xff] %vm185_vm0, %v229_v28 }
 0x1cb   : > { %v242_v29 = vld [vmem:[#allocation3] sm:$0xff] }
 0x1cc   : > { %371 = vlog2.f32 %v242_v29 }
 0x1cf   : > { %v247_v36 = vld [vmem:[#allocation4] sm:$0xff] }
 0x1d6   : > { %v372_v33 = vpop.eup %371 }
 0x1d7   : > { %v244_v34 = vmul.f32 0.6931472, %v372_v33 }
 0x1d9   : > { %v246_v37 = vadd.f32 %v245_v35, %v244_v34 }
 0x1db   : > { %v248_v38 = vsub.f32 %v246_v37, %v247_v36 }
 0x1dd   : > { %v249_v39 = vsel %vm241_vm5, %v248_v38, 0.0 }
 0x1de   : > { %250 = vst.msk [vmem:[%s178_s24] sm:$0xff] %vm185_vm0, %v249_v39 }
 0x1df PF: > { %s12_s11 = sadd.s32 1, %s395_s11   ;;  %s474_s9 = smov %s391_s10 }
 0x1e0   : > { %p9_p5 = scmp.ge.s32.totalorder %s12_s11, 5   ;;  %s475_s10 = smov %s477_s12 }
 0x1e2   :  { %11 = sbr.rel (!%p9_p5) target bundleno = 2 (0x2), region = 69 }

</bundles_post_ra>
